<compile_context>
chip_gen: v7x
topology: tpu7x:2x2x1
jax: 0.10.0
libtpu: 0.0.40
codegen_flags: <defaults>
</compile_context>

<pallas_src>
import functools

import jax
import jax.numpy as jnp
import numpy as np
from jax.experimental import pallas as pl
from jax.experimental.pallas import tpu as pltpu

DROP_P = 0.4                       # python float -> inlined literal in-kernel
KEEP_SCALE = 1.0 / (1.0 - DROP_P)  # dropout rescale, folded after linear2


def mlp_kernel(x_ref, w1_ref, b1_ref, w2_ref, b2t_ref, mask_ref, o_ref):
    # ---- linear1 + bias + ReLU (MXU + VPU) ----
    h = jnp.dot(x_ref[...], w1_ref[...], preferred_element_type=jnp.float32)
    h = jnp.maximum(h + b1_ref[...], 0.0)

    # ---- dropout(p=0.4), training mode (matches F.dropout default) ----
    # Host-precomputed int8 keep mask; 1/(1-p) rescale folded into the output.
    h = jnp.where(mask_ref[...] != 0, h, 0.0)

    # ---- linear2, emitted as the lane-dense transposed tile (O, TB) ----
    # contract w2 dim 0 with h dim 1  ==  w2^T @ h^T  (trans_a, trans_b)
    out_t = jax.lax.dot_general(
        w2_ref[...], h,
        dimension_numbers=(((0,), (1,)), ((), ())),
        preferred_element_type=jnp.float32)            # (O, TB)
    o_ref[...] = (out_t * KEEP_SCALE + b2t_ref[...]).astype(o_ref.dtype)


def _round_up(x, m):
    return (x + m - 1) // m * m


def _batch_tile(B, tile_b):
    """Batch tile TB: multiple of 32 (int8 mask sublane packing); when the
    grid has >1 step, TB is a multiple of 128 (lane-dense (O, TB) out block)
    and there are >=2 steps so v7x's two TensorCores both get work."""
    B_min = _round_up(B, 32)
    if B_min <= 256:                     # single tile == full (padded) batch
        return B_min
    return min(tile_b, _round_up(B_min // 2, 128))


@functools.partial(jax.jit, static_argnames=("tile_b",))
def mlp_forward(x, w1, b1, w2, b2, key, tile_b=512):
    """x: [B, F]; w1: [F, H]; b1: [1, H]; w2: [H, O]; b2: [1, O]."""
    B, F = x.shape
    H = w1.shape[1]
    O = w2.shape[1]

    # Pad hidden dim to lane width 128.  Padded hidden units are 0 through
    # ReLU/dropout and contribute 0 through linear2 -> numerically neutral.
    H_pad = _round_up(H, 128)
    if H_pad != H:
        w1 = jnp.pad(w1, ((0, 0), (0, H_pad - H)))
        b1 = jnp.pad(b1, ((0, 0), (0, H_pad - H)))
        w2 = jnp.pad(w2, ((0, H_pad - H), (0, 0)))

    TB = _batch_tile(B, _round_up(tile_b, 128))
    B_pad = _round_up(B, TB)
    if B_pad != B:
        x = jnp.pad(x, ((0, B_pad - B), (0, 0)))

    # Dropout keep-mask as int8 {0,1}: 1 byte/element (4x less DMA than int32
    # bits).  keep-prob = 1 - p exactly (jax bernoulli ~ torch uniform < p).
    keep_mask = jax.random.bernoulli(
        key, 1.0 - DROP_P, (B_pad, H_pad)).astype(jnp.int8)

    b2_t = b2.T                                      # (O, 1) for (O, TB) tile

    grid = (B_pad // TB,)
    out_t = pl.pallas_call(
        mlp_kernel,
        out_shape=jax.ShapeDtypeStruct((O, B_pad), jnp.float32),
        grid=grid,
        in_specs=[
            pl.BlockSpec((TB, F), lambda i: (i, 0)),
            # w1/w2/biases are grid-invariant; at F=32 their double-buffered
            # VMEM footprint is tiny (set vmem_limit_bytes if F grows large).
            pl.BlockSpec((F, H_pad), lambda i: (0, 0)),
            pl.BlockSpec((1, H_pad), lambda i: (0, 0)),
            pl.BlockSpec((H_pad, O), lambda i: (0, 0)),
            pl.BlockSpec((O, 1), lambda i: (0, 0)),
            pl.BlockSpec((TB, H_pad), lambda i: (i, 0)),
        ],
        out_specs=pl.BlockSpec((O, TB), lambda i: (0, i)),
        compiler_params=pltpu.CompilerParams(
            dimension_semantics=("parallel",)),
    )(x, w1, b1, w2, b2_t, keep_mask)

    return out_t.T[:B]                               # (B, O)


def init_params(key, n_feature, hidden=100, n_out=2):
    # Matches MLP.init_weights(): weights ~ U(-1, 1), biases = 0.
    k1, k2 = jax.random.split(key)
    # PyTorch stores weight as [out, in]; we keep the transposed [in, out].
    w1 = jax.random.uniform(k1, (hidden, n_feature),
                            minval=-1.0, maxval=1.0, dtype=jnp.float32).T
    b1 = jnp.zeros((1, hidden), jnp.float32)
    w2 = jax.random.uniform(k2, (n_out, hidden),
                            minval=-1.0, maxval=1.0, dtype=jnp.float32).T
    b2 = jnp.zeros((1, n_out), jnp.float32)
    return w1, b1, w2, b2


if __name__ == "__main__":
    key = jax.random.PRNGKey(0)
    k_x, k_p, k_drop = jax.random.split(key, 3)

    batch, n_feature, hidden, n_out = 8, 32, 100, 2
    x = jax.random.normal(k_x, (batch, n_feature), dtype=jnp.float32)
    w1, b1, w2, b2 = init_params(k_p, n_feature, hidden, n_out)

    out = mlp_forward(x, w1, b1, w2, b2, k_drop)
    jax.block_until_ready(out)
    assert out.shape == (batch, n_out) and out.dtype == jnp.float32
    assert bool(jnp.all(jnp.isfinite(out)))

    # Pure-JAX reference using the identical host-generated dropout mask.
    H_pad = _round_up(hidden, 128)
    B_pad = _round_up(batch, _batch_tile(batch, 512))
    keep = jax.random.bernoulli(
        k_drop, 1.0 - DROP_P, (B_pad, H_pad))[:batch, :hidden]
    h_ref = jnp.maximum(x @ w1 + b1, 0.0)
    ref = (jnp.where(keep, h_ref, 0.0) * KEEP_SCALE) @ w2 + b2
    np.testing.assert_allclose(np.asarray(out), np.asarray(ref),
                               rtol=1e-5, atol=1e-4)
    print("KERNEL_OK")
</pallas_src>

<mosaic_0001>
module attributes {stable_mosaic.version = 11 : i64} {
  func.func @mlp_kernel(%arg0: i32, %arg1: memref<32x32xf32, #tpu.memory_space<vmem>>, %arg2: memref<32x128xf32, #tpu.memory_space<vmem>>, %arg3: memref<1x128xf32, #tpu.memory_space<vmem>>, %arg4: memref<128x2xf32, #tpu.memory_space<vmem>>, %arg5: memref<2x1xf32, #tpu.memory_space<vmem>>, %arg6: memref<32x128xi8, #tpu.memory_space<vmem>>, %arg7: memref<2x32xf32, #tpu.memory_space<vmem>>) attributes {dimension_semantics = [#tpu.dimension_semantics<parallel>], iteration_bounds = array<i64: 1>, scalar_prefetch = 0 : i64, scratch_operands = 0 : i64, tpu.core_type = #tpu.core_type<tc>, window_params = [{transform_indices = @transform_0, window_bounds = array<i64: 32, 32>}, {pipeline_mode = #tpu.pipeline_mode<synchronous>, transform_indices = @transform_1, window_bounds = array<i64: 32, 128>}, {pipeline_mode = #tpu.pipeline_mode<synchronous>, transform_indices = @transform_2, window_bounds = array<i64: 1, 128>}, {pipeline_mode = #tpu.pipeline_mode<synchronous>, transform_indices = @transform_3, window_bounds = array<i64: 128, 2>}, {pipeline_mode = #tpu.pipeline_mode<synchronous>, transform_indices = @transform_4, window_bounds = array<i64: 2, 1>}, {transform_indices = @transform_5, window_bounds = array<i64: 32, 128>}, {transform_indices = @transform_6, window_bounds = array<i64: 2, 32>}]} {
    %c0 = arith.constant 0 : index
    %c0_0 = arith.constant 0 : index
    %0 = vector.load %arg1[%c0, %c0_0] : memref<32x32xf32, #tpu.memory_space<vmem>>, vector<32x32xf32>
    %c0_1 = arith.constant 0 : index
    %c0_2 = arith.constant 0 : index
    %1 = vector.load %arg2[%c0_1, %c0_2] : memref<32x128xf32, #tpu.memory_space<vmem>>, vector<32x128xf32>
    %cst = arith.constant dense<0.000000e+00> : vector<32x128xf32>
    %2 = tpu.matmul %0, %1, %cst {dimension_numbers = #tpu.dot_dimension_numbers<[1], [0], [0], [1], [0, 0, 1, 1], [], []>} : vector<32x32xf32>, vector<32x128xf32>, vector<32x128xf32> -> vector<32x128xf32>
    %c0_3 = arith.constant 0 : index
    %c0_4 = arith.constant 0 : index
    %3 = vector.load %arg3[%c0_3, %c0_4] : memref<1x128xf32, #tpu.memory_space<vmem>>, vector<1x128xf32>
    %4 = vector.broadcast %3 : vector<1x128xf32> to vector<32x128xf32>
    %5 = arith.addf %2, %4 : vector<32x128xf32>
    %cst_5 = arith.constant 0.000000e+00 : f32
    %6 = vector.broadcast %cst_5 : f32 to vector<32x128xf32>
    %7 = arith.maximumf %5, %6 : vector<32x128xf32>
    %c0_6 = arith.constant 0 : index
    %c0_7 = arith.constant 0 : index
    %8 = vector.load %arg6[%c0_6, %c0_7] : memref<32x128xi8, #tpu.memory_space<vmem>>, vector<32x128xi8>
    %c0_i8 = arith.constant 0 : i8
    %9 = vector.broadcast %c0_i8 : i8 to vector<32x128xi8>
    %10 = arith.cmpi ne, %8, %9 : vector<32x128xi8>
    %cst_8 = arith.constant 0.000000e+00 : f32
    %11 = vector.broadcast %cst_8 : f32 to vector<32x128xf32>
    %12 = arith.select %10, %7, %11 : vector<32x128xi1>, vector<32x128xf32>
    %c0_9 = arith.constant 0 : index
    %c0_10 = arith.constant 0 : index
    %13 = vector.load %arg4[%c0_9, %c0_10] : memref<128x2xf32, #tpu.memory_space<vmem>>, vector<128x2xf32>
    %cst_11 = arith.constant dense<0.000000e+00> : vector<2x32xf32>
    %14 = tpu.matmul %13, %12, %cst_11 {dimension_numbers = #tpu.dot_dimension_numbers<[0], [1], [1], [0], [0, 1, 1, 0], [], []>} : vector<128x2xf32>, vector<32x128xf32>, vector<2x32xf32> -> vector<2x32xf32>
    %cst_12 = arith.constant 1.66666663 : f32
    %15 = vector.broadcast %cst_12 : f32 to vector<2x32xf32>
    %16 = arith.mulf %14, %15 : vector<2x32xf32>
    %c0_13 = arith.constant 0 : index
    %c0_14 = arith.constant 0 : index
    %17 = vector.load %arg5[%c0_13, %c0_14] : memref<2x1xf32, #tpu.memory_space<vmem>>, vector<2x1xf32>
    %18 = vector.broadcast %17 : vector<2x1xf32> to vector<2x32xf32>
    %19 = arith.addf %16, %18 : vector<2x32xf32>
    %c0_15 = arith.constant 0 : index
    %c0_16 = arith.constant 0 : index
    %20 = vector.load %arg7[%c0_15, %c0_16] : memref<2x32xf32, #tpu.memory_space<vmem>>, vector<2x32xf32>
    tpu.vector_store %arg7[%c0_15, %c0_16], %19 {strides = array<i32>} : memref<2x32xf32, #tpu.memory_space<vmem>>, vector<2x32xf32>,
    return
  }
  func.func @transform_0(%arg0: i32) -> (i32, i32) {
    %c0_i32 = arith.constant 0 : i32
    %c0_i32_0 = arith.constant 0 : i32
    return %arg0, %c0_i32 : i32, i32
  }
  func.func @transform_1(%arg0: i32) -> (i32, i32) {
    %c0_i32 = arith.constant 0 : i32
    %c0_i32_0 = arith.constant 0 : i32
    %c0_i32_1 = arith.constant 0 : i32
    return %c0_i32, %c0_i32_0 : i32, i32
  }
  func.func @transform_2(%arg0: i32) -> (i32, i32) {
    %c0_i32 = arith.constant 0 : i32
    %c0_i32_0 = arith.constant 0 : i32
    %c0_i32_1 = arith.constant 0 : i32
    return %c0_i32, %c0_i32_0 : i32, i32
  }
  func.func @transform_3(%arg0: i32) -> (i32, i32) {
    %c0_i32 = arith.constant 0 : i32
    %c0_i32_0 = arith.constant 0 : i32
    %c0_i32_1 = arith.constant 0 : i32
    return %c0_i32, %c0_i32_0 : i32, i32
  }
  func.func @transform_4(%arg0: i32) -> (i32, i32) {
    %c0_i32 = arith.constant 0 : i32
    %c0_i32_0 = arith.constant 0 : i32
    %c0_i32_1 = arith.constant 0 : i32
    return %c0_i32, %c0_i32_0 : i32, i32
  }
  func.func @transform_5(%arg0: i32) -> (i32, i32) {
    %c0_i32 = arith.constant 0 : i32
    %c0_i32_0 = arith.constant 0 : i32
    return %arg0, %c0_i32 : i32, i32
  }
  func.func @transform_6(%arg0: i32) -> (i32, i32) {
    %c0_i32 = arith.constant 0 : i32
    %c0_i32_0 = arith.constant 0 : i32
    return %c0_i32, %arg0 : i32, i32
  }
}

</mosaic_0001>

<bundles_post_ra>
// kernel: mlp_forward.1
= control target key start
LH: loop header
LB: loop body
LE: loop exit
PB: predicated region body
PF: predicated region fallthrough
CT: control target
= control target key end

     0   :  { %vm41_vm0 = vcmask 261120   ;;  %s563_s0 = inlined_call_operand.vmem [shape: f32[32,32], index: 0, kind: input, shape index: {}]   ;;  %s564_s1 = inlined_call_operand.vmem [shape: f32[32,128], index: 1, kind: input, shape index: {}]   ;;  %s565_s2 = inlined_call_operand.vmem [shape: f32[1,128], index: 2, kind: input, shape index: {}]   ;;  %s566_s3 = inlined_call_operand.vmem [shape: f32[128,2], index: 3, kind: input, shape index: {}]   ;;  %s567_s4 = inlined_call_operand.vmem [shape: f32[2,1], index: 4, kind: input, shape index: {}]   ;;  %s568_s5 = inlined_call_operand.vmem [shape: s8[32,128], index: 5, kind: input, shape index: {}]   ;;  %s569_s6 = inlined_call_operand.hbm [shape: f32[2,32], index: 6, kind: output, shape index: {}]  }
   0x1   :  { %v30_v0 = vld [vmem:[%s564_s1] sm:$0xff]  ;;  %v31_v1 = vld [vmem:[%s564_s1 + $0x8] sm:$0xff]  ;;  %v32_v2 = vld [vmem:[%s564_s1 + $0x10] sm:$0xff] }
   0x2   :  { %v367_v3 = vpack.c.bf16 %v31_v1, %v30_v0  ;;  %v33_v4 = vld [vmem:[%s564_s1 + $0x18] sm:$0xff]  ;;  %v26_v5 = vld [vmem:[%s563_s0] sm:$0xff]  ;;  %v179_v8 = vld [vmem:[%s566_s3 + $0x8] sm:$0xff] }
   0x3   :  { %v371_v6 = vpack.c.bf16 %v33_v4, %v32_v2  ;;  %350 = vmatprep.mubr.msk.f32.mxu0 %vm41_vm0, %v26_v5  ;;  %v178_v7 = vld [vmem:[%s566_s3] sm:$0xff]  ;;  %v27_v9 = vld [vmem:[%s563_s0 + $0x8] sm:$0xff]  ;;  %v180_v10 = vld [vmem:[%s566_s3 + $0x10] sm:$0xff] }
   0x4   :  { %368 = vmatprep.subr.bf16.mxu0 %v367_v3  ;;  %194 = vxpose.xlu0.b32.start [1/16] (narrow) %v178_v7, 8 }
   0x5   :  { %370 = vmatpush3.bf16.msra.mxu0 %v367_v3 }
   0x6   :  { %372 = vmatprep.subr.bf16.mxu0 %v371_v6 }
   0x8   :  { %195 = vxpose.xlu0.b32.cont [2/16] (narrow) %v179_v8, 8 }
   0x9   :  { %374 = vmatpush3.bf16.msra.mxu0 %v371_v6 }
   0xa   :  { %11 = vsyncpa [#allocation3], 0  ;;  %v28_v11 = vld [vmem:[%s563_s0 + $0x10] sm:$0xff]  ;;  %v29_v12 = vld [vmem:[%s563_s0 + $0x18] sm:$0xff]  ;;  %v414_v26 = vmov 0   ;;  %v415_v27 = vmov 0.0|0.0  }
   0xb   :  { %v181_v13 = vld [vmem:[%s566_s3 + $0x18] sm:$0xff]  ;;  %v182_v14 = vld [vmem:[%s566_s3 + $0x20] sm:$0xff]  ;;  %v183_v15 = vld [vmem:[%s566_s3 + $0x28] sm:$0xff]  ;;  %388 = vset.pattern.permute.xlu1 %v414_v26  ;;  %375 = vmatprep.subr.bf16.mxu1 %v415_v27  ;;  %vm416_vm1 = vmmov 0   ;;  %v417_v28 = vmov 0.0   ;;  %vm304_vm13 = vcmask 254976  }
   0xc   :  { %351 = vmatmul.mubr.msk.f32.vlgmr.msra.gmra.mrb[0].mxu0 %vm41_vm0, %v27_v9  ;;  %196 = vxpose.xlu0.b32.cont [3/16] (narrow) %v180_v10, 8  ;;  %v184_v16 = vld [vmem:[%s566_s3 + $0x30] sm:$0xff]  ;;  %v185_v17 = vld [vmem:[%s566_s3 + $0x38] sm:$0xff]  ;;  %v186_v18 = vld [vmem:[%s566_s3 + $0x40] sm:$0xff] }
   0xd   :  { %353 = vmatprep.mubr.msk.f32.mxu0 %vm41_vm0, %v28_v11  ;;  %v187_v19 = vld [vmem:[%s566_s3 + $0x48] sm:$0xff]  ;;  %v188_v20 = vld [vmem:[%s566_s3 + $0x50] sm:$0xff]  ;;  %v189_v21 = vld [vmem:[%s566_s3 + $0x58] sm:$0xff]  ;;  %364 = vmatprep.mubr.msk.f32.mxu1 %vm416_vm1, %v417_v28 }
   0xe   :  { %v190_v22 = vld [vmem:[%s566_s3 + $0x60] sm:$0xff]  ;;  %v191_v23 = vld [vmem:[%s566_s3 + $0x68] sm:$0xff]  ;;  %v192_v24 = vld [vmem:[%s566_s3 + $0x70] sm:$0xff] }
   0xf   :  { %v193_v25 = vld [vmem:[%s566_s3 + $0x78] sm:$0xff]  ;;  %v297_v29 = vld [vmem:[%s567_s4] sm:$0x3] }
  0x10   :  { %354 = vmatmul.mubr.msk.f32.gmra.mrb[2].mxu0 %vm41_vm0, %v29_v12  ;;  %197 = vxpose.xlu0.b32.cont [4/16] (narrow) %v181_v13, 8  ;;  %v143_v30 = vld [vmem:[%s568_s5] sm:$0xff] }
  0x11   :  { %300 = vperm.xlu1 %388, %v297_v29   ;;  %vm144_vm2 = vnez %v143_v30  ;;  %v320_v46 = vld [vmem:[%s565_s2] ss:$0 sm:$0xff]  ;;  %s418_s2 = smov [#allocation2]  }
  0x12   :  { %v145_v31 = vsel %vm144_vm2, 16843009, %v414_v26  ;;  %s312_s5 = sshll.u32 %s418_s2, 4  ;;  %s313_s5 = int_to_ptr.vmem [resolvable:$true] %s312_s5 }
  0x13   :  { %v146_v32 = vunpack.c.0.s8 %v145_v31  ;;  %v147_v33 = vunpack.c.1.s8 %v145_v31  ;;  %v148_v38 = vunpack.c.2.s8 %v145_v31  ;;  %v149_v39 = vunpack.c.3.s8 %v145_v31  ;;  %s390_s22 = scalar_lea.vmem %s313_s5, 32  ;;  %p395_p1 = scmp.lt.s32.totalorder %s313_s5, %s313_s5 }
  0x14   :  { %198 = vxpose.xlu0.b32.cont [5/16] (narrow) %v182_v14, 8  ;;  %p391_p0 = scmp.ne.s32.totalorder %s313_s5, %s390_s22  ;;  %p396_p2 = scmp.lt.s32.totalorder %s390_s22, %s390_s22 }
  0x15   :  { %v150_v34 = vpack.c.b16 %v146_v32, %v146_v32  ;;  %v152_v35 = vpack.c.b16 %v147_v33, %v147_v33  ;;  %v154_v40 = vpack.c.b16 %v148_v38, %v148_v38  ;;  %v156_v41 = vpack.c.b16 %v149_v39, %v149_v39 }
  0x16   :  { %p397_p3 = por %p396_p2, %p395_p1 }
  0x17   :  { %v151_v36 = vpack.c.b8 %v150_v34, %v150_v34  ;;  %v153_v37 = vpack.c.b8 %v152_v35, %v152_v35  ;;  %v155_v44 = vpack.c.b8 %v154_v40, %v154_v40  ;;  %v157_v45 = vpack.c.b8 %v156_v41, %v156_v41 }
  0x18   :  { %199 = vxpose.xlu0.b32.cont [6/16] (narrow) %v183_v15, 8  ;;  %p398_p4 = pnand %p397_p3, %p391_p0 }
  0x19   :  { %vm158_vm3 = vnez %v151_v36  ;;  %vm159_vm4 = vnez %v153_v37  ;;  %vm160_vm5 = vnez %v155_v44  ;;  %vm161_vm6 = vnez %v157_v45 }
  0x1a   :  { %v162_v42 = vsel %vm158_vm3, 16843009, %v414_v26  ;;  %v163_v43 = vsel %vm159_vm4, 16843009, %v414_v26  ;;  %v164_v56 = vsel %vm160_vm5, 16843009, %v414_v26 }
  0x1b   :  { %v166_v47 = vunpack.c.0.s8 %v162_v42  ;;  %v167_v48 = vunpack.c.0.s8 %v163_v43  ;;  %v165_v57 = vsel %vm161_vm6, 16843009, %v414_v26  ;;  %v168_v0 = vunpack.c.0.s8 %v164_v56 }
  0x1c   :  { %200 = vxpose.xlu0.b32.cont [7/16] (narrow) %v184_v16, 8  ;;  %v169_v1 = vunpack.c.0.s8 %v165_v57 }
  0x1d   :  { %vm539_vm7 = vcmp.ne.s32.totalorder %v166_v47, 0  ;;  %vm543_vm8 = vcmp.ne.s32.totalorder %v167_v48, 0  ;;  %vm172_vm10 = vcmp.ne.s32.totalorder %v168_v0, 0 }
  0x1e   :  { %vm377_vm9 = vmpackc.low %vm543_vm8, %vm539_vm7  ;;  %vm173_vm11 = vcmp.ne.s32.totalorder %v169_v1, 0 }
  0x1f   :  { %vm381_vm12 = vmpackc.low %vm173_vm11, %vm172_vm10 }
  0x20   :  { %201 = vxpose.xlu0.b32.cont [8/16] (narrow) %v185_v17, 8 }
  0x24   :  { %202 = vxpose.xlu0.b32.cont [9/16] (narrow) %v186_v18, 8 }
  0x28   :  { %203 = vxpose.xlu0.b32.cont [10/16] (narrow) %v187_v19, 8 }
  0x2c   :  { %204 = vxpose.xlu0.b32.cont [11/16] (narrow) %v188_v20, 8 }
  0x30   :  { %205 = vxpose.xlu0.b32.cont [12/16] (narrow) %v189_v21, 8 }
  0x34   :  { %206 = vxpose.xlu0.b32.cont [13/16] (narrow) %v190_v22, 8 }
  0x38   :  { %207 = vxpose.xlu0.b32.cont [14/16] (narrow) %v191_v23, 8 }
  0x3c   :  { %208 = vxpose.xlu0.b32.cont [15/16] (narrow) %v192_v24, 8 }
  0x40   :  { %209 = vxpose.xlu0.b32.end [16/16] (narrow) %v193_v25, 8 }
  0x69   :  { %389 = vset.pattern.permute.xlu0 %v414_v26 }
  0x84   :  { %v210_v5 = vpop.trf.xlu0 }
  0x90   :  { %v301_v7 = vpop.permute.xlu1 %300 }
  0xdf   :  { %v352_v49 = vpop.f32.mrb[0].mxu0 }
  0xe0   :  { %v126_v50 = vadd.f32 %v352_v49, %v320_v46  ;;  %v120_v51 = vpop.f32.mrb[1].mxu0 }
  0xe1   :  { %v121_v52 = vadd.f32 %v320_v46, %v120_v51 }
  0xe2   :  { %v140_v55 = vmax.f32 %v126_v50, 0.0 }
  0xe3   :  { %v139_v58 = vmax.f32 %v121_v52, 0.0  ;;  %v355_v59 = vpop.f32.mrb[2].mxu0 }
  0xe4   :  { %v136_v60 = vadd.f32 %v355_v59, %v320_v46  ;;  %v130_v61 = vpop.f32.mrb[3].mxu0 }
  0xe5   :  { %v376_v62 = vpack.c.bf16 %v140_v55, %v139_v58  ;;  %v131_v63 = vadd.f32 %v320_v46, %v130_v61 }
  0xe6   :  { %v142_v2 = vmax.f32 %v136_v60, 0.0 }
  0xe7   :  { %v141_v3 = vmax.f32 %v131_v63, 0.0  ;;  %378 = vmatpush3.bf16.xpose.msk.msra.mxu1 %vm377_vm9, %v376_v62 }
  0xe8   :  { %379 = vmatprep.subr.bf16.mxu1 %v415_v27 }
  0xe9   :  { %v380_v4 = vpack.c.bf16 %v142_v2, %v141_v3 }
  0xef   :  { %382 = vmatpush3.bf16.xpose.msk.msra.mxu1 %vm381_vm12, %v380_v4 }
  0xf6   :  { %365 = vmatmul.mubr.f32.vlgmr.msra.gmra.mrb[0].mxu1 %v210_v5 }
 0x1c9   :  { %v292_v6 = vpop.f32.mrb[0].mxu1 }
 0x1ca   :  { %v296_v8 = vmul.f32 1.6666666, %v292_v6  ;;  %v366_v9 = vpop.f32.mrb[1].mxu1 }
 0x1cc   :  { %v303_v10 = vadd.f32 %v301_v7, %v296_v8 }
 0x1ce   :  { %305 = vst.msk [vmem:[#allocation2] sm:$0x3] %vm304_vm13, %v303_v10 }
 0x1cf   :  { %401 = shalt.err (!%p398_p4)
}
 0x1d0   :  { %s402_s25 = scalar_lea.hbm %s569_s6, 32 }
 0x1d1   :  { %p403_p5 = scmp.ne.s32.totalorder %s569_s6, %s402_s25  ;;  %p406_p6 = scmp.lt.u32.totalorder %s402_s25, %s569_s6 }
 0x1d3   :  { %p408_p7 = pnand %p406_p6, %p403_p5 }
 0x1d5   :  { %411 = shalt.err (!%p408_p7)
}
 0x1d6   :  { %315 = dma.vmem_to_hbm [thread:$0]  %s313_s5, 32, %s569_s6, [#allocation3]  }
 0x1d7   :  { %412 = dma.done.wait [#allocation3], 32  }
 0x1d8   :  { %413 = vsyncadd [#allocation3], 4294967264 }
 0x1d9   :  { %319 = vsyncpa [#allocation3], 1 }

</bundles_post_ra>
